<compile_context>
chip_gen: v7x
topology: tpu7x:2x2x1
jax: 0.10.0
libtpu: 0.0.40
codegen_flags: <defaults>
</compile_context>

<pallas_src>
import functools

import jax
import jax.numpy as jnp
from jax.experimental import pallas as pl
from jax.experimental.pallas import tpu as pltpu

_LANE = 128


def _round_up(x, m):
    return ((x + m - 1) // m) * m


def _device_kind():
    try:
        return jax.devices()[0].device_kind.lower()
    except Exception:
        return ""


def _is_v7x(kind):
    return "7" in kind


def _default_tm(kind):
    # v7x has 64 MiB VMEM per TC -> keep 256; v5e/v6e (128 MiB) take 512.
    return 256 if _is_v7x(kind) else 512


def _pick_tk(C):
    # K-chunk for the fc1 contraction; must divide C exactly (ragged K would
    # add garbage into the accumulator). Falls back to a single chunk.
    for tk in (1024, 512, 256):
        if C % tk == 0:
            return tk
    return C


def _vmem_limit_bytes(tm, tk, H, is_v7x):
    # Default double-buffered blocks: weights (bf16) + biases (f32),
    # x tile (f32), out tile (bf16); plus the f32 fc1 accumulator scratch.
    w_bytes = 2 * ((tk * H + H * H + H * _LANE) * 2 + (2 * H + _LANE) * 4)
    x_bytes = 2 * tm * tk * 4
    o_bytes = 2 * tm * _LANE * 2
    acc_bytes = tm * H * 4
    est = w_bytes + x_bytes + o_bytes + acc_bytes + (8 << 20)  # + headroom
    cap = (40 << 20) if is_v7x else (100 << 20)
    return int(min(max(est, 16 << 20), cap))


def _instance_da_kernel(x_ref, w1_ref, b1_ref, w2_ref, b2_ref, w3_ref, b3_ref,
                        out_ref, acc_ref):
    # grad_reverse (GRLayer) is identity in the forward pass.
    # TODO(synk): backward GRL (grad * -0.1) would need a jax.custom_vjp wrapper.
    k = pl.program_id(1)

    @pl.when(k == 0)
    def _():
        acc_ref[...] = jnp.zeros_like(acc_ref)

    # fc1 partial contraction over this K chunk: x arrives f32 from HBM and is
    # cast to bf16 on the VPU right before the MXU (f32 accumulation).
    x = x_ref[...].astype(jnp.bfloat16)
    acc_ref[...] += jnp.dot(x, w1_ref[...], preferred_element_type=jnp.float32)

    @pl.when(k == pl.num_programs(1) - 1)
    def _():
        # fc1 bias + ReLU.
        h1 = jnp.maximum(acc_ref[...] + b1_ref[...], 0.0)
        # TODO(synk): nn.Dropout(p=0.5) is identity in eval mode; training-mode
        # stochastic masking (pltpu.stateful_bernoulli) is not implemented here.

        # fc2 + ReLU.
        h2 = jnp.dot(h1.astype(jnp.bfloat16), w2_ref[...],
                     preferred_element_type=jnp.float32)
        h2 = jnp.maximum(h2 + b2_ref[...], 0.0)

        # Classifier: W3 zero-padded from width 1 -> 128 lanes so the store is
        # lane-dense (unmasked vst). Column 0 carries the real logit.
        logits = jnp.dot(h2.astype(jnp.bfloat16), w3_ref[...],
                         preferred_element_type=jnp.float32) + b3_ref[...]
        out_ref[...] = jax.nn.sigmoid(logits).astype(out_ref.dtype)


@functools.lru_cache(maxsize=None)
def _build_call(N, C, H, tm, tk, vmem_limit_bytes):
    """Constructs the pallas_call for the fused 3-layer MLP."""
    n_rows = pl.cdiv(N, tm)
    n_k = C // tk
    in_specs = [
        pl.BlockSpec((tm, tk), lambda i, k: (i, k)),        # x tile (f32)
        pl.BlockSpec((tk, H), lambda i, k: (k, 0)),         # W1 chunk (bf16)
        pl.BlockSpec((1, H), lambda i, k: (0, 0)),          # b1 (f32)
        pl.BlockSpec((H, H), lambda i, k: (0, 0)),          # W2 (bf16)
        pl.BlockSpec((1, H), lambda i, k: (0, 0)),          # b2 (f32)
        pl.BlockSpec((H, _LANE), lambda i, k: (0, 0)),      # W3 padded (bf16)
        pl.BlockSpec((1, _LANE), lambda i, k: (0, 0)),      # b3 padded (f32)
    ]
    return pl.pallas_call(
        _instance_da_kernel,
        out_shape=jax.ShapeDtypeStruct((N, _LANE), jnp.bfloat16),
        grid_spec=pltpu.PrefetchScalarGridSpec(
            num_scalar_prefetch=0,
            grid=(n_rows, n_k),
            in_specs=in_specs,
            out_specs=pl.BlockSpec((tm, _LANE), lambda i, k: (i, 0)),
            scratch_shapes=[pltpu.VMEM((tm, H), jnp.float32)],
        ),
        compiler_params=pltpu.CompilerParams(
            dimension_semantics=("parallel", "arbitrary"),
            vmem_limit_bytes=vmem_limit_bytes,
        ),
    )


def prepare_params(params):
    """One-time conversion of raw f32 Linear params into kernel layout.

    Call once; reuse the result across forward calls (avoids per-call bf16
    casts / lane-padding HBM passes).
    """
    w1, b1, w2, b2, w3, b3 = params
    H = w1.shape[1]
    w1_b = jnp.asarray(w1, jnp.float32).astype(jnp.bfloat16)
    w2_b = jnp.asarray(w2, jnp.float32).astype(jnp.bfloat16)
    w3_p = jnp.zeros((H, _LANE), jnp.bfloat16).at[:, :1].set(
        jnp.asarray(w3, jnp.float32).astype(jnp.bfloat16).reshape(H, 1))
    b1_r = jnp.asarray(b1, jnp.float32).reshape(1, H)
    b2_r = jnp.asarray(b2, jnp.float32).reshape(1, H)
    b3_p = jnp.zeros((1, _LANE), jnp.float32).at[:, :1].set(
        jnp.asarray(b3, jnp.float32).reshape(1, 1))
    return (w1_b, b1_r, w2_b, b2_r, w3_p, b3_p)


def instance_da_forward(x, prepared_params, need_backprop, *, tm=None,
                        minibatch=256):
    """x: [N, C] float32. Returns (probs [N, 1] float32, label [N, 1] float32)."""
    w1_b, b1_r, w2_b, b2_r, w3_p, b3_p = prepared_params
    N, C = x.shape
    H = w1_b.shape[1]

    kind = _device_kind()
    if tm is None:
        tm = _default_tm(kind)
    # Shrink the row tile so the row grid has >= 2 steps when N is small
    # (gives the second v7x TensorCore work; negligible cost on v5e/v6e).
    tm = max(8, min(tm, _round_up(pl.cdiv(N, 2), 8)))
    tk = _pick_tk(C)

    vmem_limit = _vmem_limit_bytes(tm, tk, H, _is_v7x(kind))

    out = _build_call(N, C, H, tm, tk, vmem_limit)(
        x.astype(jnp.float32), w1_b, b1_r, w2_b, b2_r, w3_p, b3_p)

    # Column 0 carries the logit; the slab is bf16 / 128-lane padded purely for
    # lane-dense stores.
    probs = out[:, :1].astype(jnp.float32)

    # InstanceLabelResizeLayer (reconstructed; class body not in the provided
    # source): label for ROI r is need_backprop[r // minibatch], default 1.0
    # past the covered range, shape [N, 1].
    # TODO(synk): if the reference resizes per-image with variable ROI counts,
    # replace this fixed-minibatch reconstruction.
    nb = need_backprop.reshape(-1).astype(jnp.float32)
    idx = jnp.arange(N) // minibatch
    in_range = idx < nb.shape[0]
    label = jnp.where(in_range, nb[jnp.minimum(idx, nb.shape[0] - 1)],
                      1.0).reshape(N, 1)

    return probs, label


def init_params(key, in_channel, hidden):
    k1, k2, k3, k4, k5, k6 = jax.random.split(key, 6)

    def lin(kw, kb, fan_in, fan_out):
        bound = 1.0 / jnp.sqrt(fan_in)
        w = jax.random.uniform(kw, (fan_in, fan_out), jnp.float32, -bound, bound)
        b = jax.random.uniform(kb, (1, fan_out), jnp.float32, -bound, bound)
        return w, b

    w1, b1 = lin(k1, k2, in_channel, hidden)
    w2, b2 = lin(k3, k4, hidden, hidden)
    w3, b3 = lin(k5, k6, hidden, 1)
    return (w1, b1, w2, b2, w3, b3)


if __name__ == "__main__":
    # Small shapes consistent with the module (real module: in_channel=4096,
    # hidden=1024; scaled down here). N deliberately not a multiple of the
    # row tile so the ragged-grid path is exercised.
    N, C, H = 37, 256, 128
    key = jax.random.PRNGKey(0)
    kx, kp = jax.random.split(key)

    x = jax.random.normal(kx, (N, C), jnp.float32)
    need_backprop = jnp.array([1.0], jnp.float32)   # one source-domain image
    params = init_params(kp, C, H)
    prepared = prepare_params(params)               # one-time, kernel layout

    probs, label = instance_da_forward(x, prepared, need_backprop)
    jax.block_until_ready((probs, label))

    # Reference with the same bf16-operand / f32-accumulation quantization.
    w1, b1, w2, b2, w3, b3 = params
    xb = x.astype(jnp.bfloat16)
    h1 = jnp.maximum(jnp.dot(xb, w1.astype(jnp.bfloat16),
                             preferred_element_type=jnp.float32) + b1, 0.0)
    h2 = jnp.maximum(jnp.dot(h1.astype(jnp.bfloat16), w2.astype(jnp.bfloat16),
                             preferred_element_type=jnp.float32) + b2, 0.0)
    ref = jax.nn.sigmoid(jnp.dot(h2.astype(jnp.bfloat16), w3.astype(jnp.bfloat16),
                                 preferred_element_type=jnp.float32) + b3)

    assert probs.shape == (N, 1) and label.shape == (N, 1)
    assert bool(jnp.all(label == 1.0))
    # probs are stored bf16 (lane-dense writeback), so allow bf16 round-off.
    assert float(jnp.max(jnp.abs(probs - ref))) < 1e-2

    print("KERNEL_OK")
</pallas_src>

<mosaic_0001>
module attributes {stable_mosaic.version = 11 : i64} {
  func.func @_instance_da_kernel(%arg0: i32, %arg1: i32, %arg2: memref<24x256xf32, #tpu.memory_space<vmem>>, %arg3: memref<256x128xbf16, #tpu.memory_space<vmem>>, %arg4: memref<1x128xf32, #tpu.memory_space<vmem>>, %arg5: memref<128x128xbf16, #tpu.memory_space<vmem>>, %arg6: memref<1x128xf32, #tpu.memory_space<vmem>>, %arg7: memref<128x128xbf16, #tpu.memory_space<vmem>>, %arg8: memref<1x128xf32, #tpu.memory_space<vmem>>, %arg9: memref<24x128xbf16, #tpu.memory_space<vmem>>, %arg10: memref<24x128xf32, #tpu.memory_space<vmem>>) attributes {dimension_semantics = [#tpu.dimension_semantics<parallel>, #tpu.dimension_semantics<arbitrary>], iteration_bounds = array<i64: 2, 1>, scalar_prefetch = 0 : i64, scratch_operands = 1 : i64, tpu.core_type = #tpu.core_type<tc>, window_params = [{transform_indices = @transform_0, window_bounds = array<i64: 24, 256>}, {transform_indices = @transform_1, window_bounds = array<i64: 256, 128>}, {pipeline_mode = #tpu.pipeline_mode<synchronous>, transform_indices = @transform_2, window_bounds = array<i64: 1, 128>}, {pipeline_mode = #tpu.pipeline_mode<synchronous>, transform_indices = @transform_3, window_bounds = array<i64: 128, 128>}, {pipeline_mode = #tpu.pipeline_mode<synchronous>, transform_indices = @transform_4, window_bounds = array<i64: 1, 128>}, {pipeline_mode = #tpu.pipeline_mode<synchronous>, transform_indices = @transform_5, window_bounds = array<i64: 128, 128>}, {pipeline_mode = #tpu.pipeline_mode<synchronous>, transform_indices = @transform_6, window_bounds = array<i64: 1, 128>}, {transform_indices = @transform_7, window_bounds = array<i64: 24, 128>}]} {
    %c0_i32 = arith.constant 0 : i32
    %0 = arith.cmpi eq, %arg1, %c0_i32 : i32
    %1 = arith.extui %0 : i1 to i32
    %c0_i32_0 = arith.constant 0 : i32
    %2 = arith.cmpi ne, %1, %c0_i32_0 : i32
    scf.if %2 {
      %cst_10 = arith.constant 0.000000e+00 : f32
      %13 = vector.broadcast %cst_10 : f32 to vector<24x128xf32>
      %c0_11 = arith.constant 0 : index
      %c0_12 = arith.constant 0 : index
      %14 = vector.load %arg10[%c0_11, %c0_12] : memref<24x128xf32, #tpu.memory_space<vmem>>, vector<24x128xf32>
      tpu.vector_store %arg10[%c0_11, %c0_12], %13 {strides = array<i32>} : memref<24x128xf32, #tpu.memory_space<vmem>>, vector<24x128xf32>,
    } else {
    }
    %c0 = arith.constant 0 : index
    %c0_1 = arith.constant 0 : index
    %3 = vector.load %arg2[%c0, %c0_1] : memref<24x256xf32, #tpu.memory_space<vmem>>, vector<24x256xf32>
    %4 = arith.truncf %3 : vector<24x256xf32> to vector<24x256xbf16>
    %c0_2 = arith.constant 0 : index
    %c0_3 = arith.constant 0 : index
    %5 = vector.load %arg10[%c0_2, %c0_3] : memref<24x128xf32, #tpu.memory_space<vmem>>, vector<24x128xf32>
    %c0_4 = arith.constant 0 : index
    %c0_5 = arith.constant 0 : index
    %6 = vector.load %arg3[%c0_4, %c0_5] : memref<256x128xbf16, #tpu.memory_space<vmem>>, vector<256x128xbf16>
    %cst = arith.constant dense<0.000000e+00> : vector<24x128xf32>
    %7 = tpu.matmul %4, %6, %cst {dimension_numbers = #tpu.dot_dimension_numbers<[1], [0], [0], [1], [0, 0, 1, 1], [], []>} : vector<24x256xbf16>, vector<256x128xbf16>, vector<24x128xf32> -> vector<24x128xf32>
    %8 = arith.addf %5, %7 : vector<24x128xf32>
    %c0_6 = arith.constant 0 : index
    %c0_7 = arith.constant 0 : index
    %9 = vector.load %arg10[%c0_6, %c0_7] : memref<24x128xf32, #tpu.memory_space<vmem>>, vector<24x128xf32>
    tpu.vector_store %arg10[%c0_6, %c0_7], %8 {strides = array<i32>} : memref<24x128xf32, #tpu.memory_space<vmem>>, vector<24x128xf32>,
    %c0_i32_8 = arith.constant 0 : i32
    %10 = arith.cmpi eq, %arg1, %c0_i32_8 : i32
    %11 = arith.extui %10 : i1 to i32
    %c0_i32_9 = arith.constant 0 : i32
    %12 = arith.cmpi ne, %11, %c0_i32_9 : i32
    scf.if %12 {
      %c0_10 = arith.constant 0 : index
      %c0_11 = arith.constant 0 : index
      %13 = vector.load %arg10[%c0_10, %c0_11] : memref<24x128xf32, #tpu.memory_space<vmem>>, vector<24x128xf32>
      %c0_12 = arith.constant 0 : index
      %c0_13 = arith.constant 0 : index
      %14 = vector.load %arg4[%c0_12, %c0_13] : memref<1x128xf32, #tpu.memory_space<vmem>>, vector<1x128xf32>
      %15 = vector.broadcast %14 : vector<1x128xf32> to vector<24x128xf32>
      %16 = arith.addf %13, %15 : vector<24x128xf32>
      %cst_14 = arith.constant 0.000000e+00 : f32
      %17 = vector.broadcast %cst_14 : f32 to vector<24x128xf32>
      %18 = arith.maximumf %16, %17 : vector<24x128xf32>
      %19 = arith.truncf %18 : vector<24x128xf32> to vector<24x128xbf16>
      %c0_15 = arith.constant 0 : index
      %c0_16 = arith.constant 0 : index
      %20 = vector.load %arg5[%c0_15, %c0_16] : memref<128x128xbf16, #tpu.memory_space<vmem>>, vector<128x128xbf16>
      %cst_17 = arith.constant dense<0.000000e+00> : vector<24x128xf32>
      %21 = tpu.matmul %19, %20, %cst_17 {dimension_numbers = #tpu.dot_dimension_numbers<[1], [0], [0], [1], [0, 0, 1, 1], [], []>} : vector<24x128xbf16>, vector<128x128xbf16>, vector<24x128xf32> -> vector<24x128xf32>
      %c0_18 = arith.constant 0 : index
      %c0_19 = arith.constant 0 : index
      %22 = vector.load %arg6[%c0_18, %c0_19] : memref<1x128xf32, #tpu.memory_space<vmem>>, vector<1x128xf32>
      %23 = vector.broadcast %22 : vector<1x128xf32> to vector<24x128xf32>
      %24 = arith.addf %21, %23 : vector<24x128xf32>
      %cst_20 = arith.constant 0.000000e+00 : f32
      %25 = vector.broadcast %cst_20 : f32 to vector<24x128xf32>
      %26 = arith.maximumf %24, %25 : vector<24x128xf32>
      %27 = arith.truncf %26 : vector<24x128xf32> to vector<24x128xbf16>
      %c0_21 = arith.constant 0 : index
      %c0_22 = arith.constant 0 : index
      %28 = vector.load %arg7[%c0_21, %c0_22] : memref<128x128xbf16, #tpu.memory_space<vmem>>, vector<128x128xbf16>
      %cst_23 = arith.constant dense<0.000000e+00> : vector<24x128xf32>
      %29 = tpu.matmul %27, %28, %cst_23 {dimension_numbers = #tpu.dot_dimension_numbers<[1], [0], [0], [1], [0, 0, 1, 1], [], []>} : vector<24x128xbf16>, vector<128x128xbf16>, vector<24x128xf32> -> vector<24x128xf32>
      %c0_24 = arith.constant 0 : index
      %c0_25 = arith.constant 0 : index
      %30 = vector.load %arg8[%c0_24, %c0_25] : memref<1x128xf32, #tpu.memory_space<vmem>>, vector<1x128xf32>
      %31 = vector.broadcast %30 : vector<1x128xf32> to vector<24x128xf32>
      %32 = arith.addf %29, %31 : vector<24x128xf32>
      %33 = arith.negf %32 : vector<24x128xf32>
      %34 = math.exp %33 : vector<24x128xf32>
      %cst_26 = arith.constant 1.000000e+00 : f32
      %35 = vector.broadcast %cst_26 : f32 to vector<24x128xf32>
      %36 = arith.addf %35, %34 : vector<24x128xf32>
      %37 = arith.divf %35, %36 : vector<24x128xf32>
      %38 = arith.truncf %37 : vector<24x128xf32> to vector<24x128xbf16>
      %c0_27 = arith.constant 0 : index
      %c0_28 = arith.constant 0 : index
      %39 = vector.load %arg9[%c0_27, %c0_28] : memref<24x128xbf16, #tpu.memory_space<vmem>>, vector<24x128xbf16>
      tpu.vector_store %arg9[%c0_27, %c0_28], %38 {strides = array<i32>} : memref<24x128xbf16, #tpu.memory_space<vmem>>, vector<24x128xbf16>,
    } else {
    }
    return
  }
  func.func @transform_0(%arg0: i32, %arg1: i32) -> (i32, i32) {
    %c0_i32 = arith.constant 0 : i32
    return %arg0, %arg1 : i32, i32
  }
  func.func @transform_1(%arg0: i32, %arg1: i32) -> (i32, i32) {
    %c0_i32 = arith.constant 0 : i32
    %c0_i32_0 = arith.constant 0 : i32
    return %arg1, %c0_i32 : i32, i32
  }
  func.func @transform_2(%arg0: i32, %arg1: i32) -> (i32, i32) {
    %c0_i32 = arith.constant 0 : i32
    %c0_i32_0 = arith.constant 0 : i32
    %c0_i32_1 = arith.constant 0 : i32
    return %c0_i32, %c0_i32_0 : i32, i32
  }
  func.func @transform_3(%arg0: i32, %arg1: i32) -> (i32, i32) {
    %c0_i32 = arith.constant 0 : i32
    %c0_i32_0 = arith.constant 0 : i32
    %c0_i32_1 = arith.constant 0 : i32
    return %c0_i32, %c0_i32_0 : i32, i32
  }
  func.func @transform_4(%arg0: i32, %arg1: i32) -> (i32, i32) {
    %c0_i32 = arith.constant 0 : i32
    %c0_i32_0 = arith.constant 0 : i32
    %c0_i32_1 = arith.constant 0 : i32
    return %c0_i32, %c0_i32_0 : i32, i32
  }
  func.func @transform_5(%arg0: i32, %arg1: i32) -> (i32, i32) {
    %c0_i32 = arith.constant 0 : i32
    %c0_i32_0 = arith.constant 0 : i32
    %c0_i32_1 = arith.constant 0 : i32
    return %c0_i32, %c0_i32_0 : i32, i32
  }
  func.func @transform_6(%arg0: i32, %arg1: i32) -> (i32, i32) {
    %c0_i32 = arith.constant 0 : i32
    %c0_i32_0 = arith.constant 0 : i32
    %c0_i32_1 = arith.constant 0 : i32
    return %c0_i32, %c0_i32_0 : i32, i32
  }
  func.func @transform_7(%arg0: i32, %arg1: i32) -> (i32, i32) {
    %c0_i32 = arith.constant 0 : i32
    %c0_i32_0 = arith.constant 0 : i32
    return %arg0, %c0_i32 : i32, i32
  }
}

</mosaic_0001>

<bundles_post_ra>
// kernel: tpu_custom_call.1
= control target key start
LH: loop header
LB: loop body
LE: loop exit
PB: predicated region body
PF: predicated region fallthrough
CT: control target
= control target key end

     0   :  { %s1906_s0 = inlined_call_operand.hbm [shape: f32[37,256], index: 0, kind: input, shape index: {}]   ;;  %s1907_s1 = inlined_call_operand.hbm [shape: bf16[256,128], index: 1, kind: input, shape index: {}]   ;;  %s1908_s2 = inlined_call_operand.vmem [shape: f32[1,128], index: 2, kind: input, shape index: {}]   ;;  %s1909_s3 = inlined_call_operand.hbm [shape: bf16[128,128], index: 3, kind: input, shape index: {}]   ;;  %s1910_s4 = inlined_call_operand.vmem [shape: f32[1,128], index: 4, kind: input, shape index: {}]   ;;  %s1911_s5 = inlined_call_operand.hbm [shape: bf16[128,128], index: 5, kind: input, shape index: {}]   ;;  %s1912_s6 = inlined_call_operand.vmem [shape: f32[1,128], index: 6, kind: input, shape index: {}]   ;;  %s1913_s7 = inlined_call_operand.hbm [shape: bf16[37,128], index: 7, kind: output, shape index: {}]  }
   0x1   :  { %1923 = sst [smem:[#allocation22_spill]] %s1913_s7 }
   0x2   :  { %12 = vsyncpa [#allocation4], 0 }
   0x3   :  { %14 = vsyncpa [#allocation4 + $0x1], 0 }
   0x4   :  { %15 = vsyncpa [#allocation7], 0 }
   0x5   :  { %16 = vsyncpa [#allocation10], 0 }
   0x6   :  { %17 = vsyncpa [#allocation5], 0 }
   0x7   :  { %19 = vsyncpa [#allocation5 + $0x1], 0  ;;  %s1583_s24 = smov 0   ;;  %s1585_s25 = smov 0  }
   0x8   :  { %s1587_s26 = smov 0   ;;  %s1589_s27 = smov 0  }
   0x9   :  { %s1591_s28 = smov 0   ;;  %s1593_s29 = smov 0  }
   0xa LB: > { %1924 = sst [smem:[#allocation16_spill]] %s1510_s24  ;;  %s1022_s30 = sadd.s32 4294967295, %s1530_s29   ;;  %s1530_s29 = sphi %s1593_s29, %s25_s29   ;;  %s1526_s28 = sphi %s1591_s28, %s1953_s28   ;;  %s1522_s27 = sphi %s1589_s27, %s1952_s27   ;;  %s1518_s26 = sphi %s1587_s26, %s1951_s26   ;;  %s1514_s25 = sphi %s1585_s25, %s1950_s25   ;;  %s1510_s24 = sphi %s1583_s24, %s1949_s24  }
   0xb   : > { %1925 = sst [smem:[#allocation17_spill]] %s1522_s27  ;;  %s1023_s8 = sadd.s32 4294967294, %s1530_s29  }
   0xc   : > { %s37_s9 = sadd.s32 1, %s1526_s28  ;;  %s46_s10 = sadd.s32 1, %s1518_s26 }
   0xd   : > { %p39_p0 = scmp.ge.s32.totalorder %s37_s9, 2  ;;  %p53_p1 = scmp.ne.s32.totalorder %s1518_s26, %s1514_s25 }
   0xe   : > { %p54_p2 = scmp.eq.s32.totalorder %s1530_s29, 0  ;;  %p59_p3 = scmp.ne.s32.totalorder %s1514_s25, %s1510_s24 }
   0xf   : > { %s1955_s9 = smov (%p39_p0, %s37_s9), 0  ;;  %p1628_p5 = scmp.eq.s32.totalorder %s1022_s30, 0 }
  0x10   : > { %1926 = sst [smem:[#allocation18_spill]] %s1955_s9  ;;  %p1624_p4 = por %p54_p2, %p53_p1 }
  0x11   : > { %s1928_s12 = scalar_select %p1628_p5, 1, 0 }
  0x12   : > { %s41_s13 = ssub.s32 %s1526_s28, %s1955_s9  ;;  %p214_p6 = scmp.eq.s32.totalorder %s1022_s30, 1 }
  0x13   : > { %p44_p7 = scmp.eq.s32.totalorder %s41_s13, 0  ;;  %p1636_p8 = por %p1628_p5, %p59_p3 }
  0x14   : > { %p1640_p9 = por %p214_p6, %p53_p1  ;;  %p220_p10 = scmp.eq.s32.totalorder %s1023_s8, 1 }
  0x15   : > { %s1929_s14 = scalar_select %p1636_p8, 1, 0 }
  0x16   : > { %s1930_s15 = scalar_select %p1640_p9, 1, 0 }
  0x17   : > { %s1645_s16 = scalar_select %p44_p7, %s1518_s26, %s46_s10  }
  0x18   : > { %1931 = sst [smem:[#allocation19_spill]] %s1930_s15  ;;  %p1647_p11 = por %p220_p10, %p59_p3 }
  0x19   : > { %1932 = sst [smem:[#allocation20_spill]] %s1645_s16  ;;  %p1024_p12 = scmp.ge.s32.totalorder %s1530_s29, 1 }
  0x1a   : > { %s1933_s17 = scalar_select %p1647_p11, 1, 0 }
  0x1b   : > { %p227_p13 = scmp.lt.s32.totalorder %s1530_s29, 3  ;;  %s1532_s19 = smov [#allocation6]  }
  0x1c   : > { %1934 = sst [smem:[#allocation21_spill]] %s1933_s17  ;;  %s242_s20 = sshll.u32 %s1532_s19, 4  ;;  %s1657_s20 = int_to_ptr.vmem [resolvable:$true] %s242_s20 }
  0x1d   : > { %p1653_p0 = pnand %p1024_p12, %p227_p13  ;;  %s1533_s21 = smov [#allocation8]  }
  0x1e   : > { %s258_s22 = sshll.u32 %s1533_s21, 4  ;;  %s1534_s30 = smov [#allocation9]   ;;  %s1667_s22 = int_to_ptr.vmem [resolvable:$true] %s258_s22 }
  0x1f   : > { %p1206_p1 = pneg %p1653_p0  ;;  %s274_s8 = sshll.u32 %s1534_s30, 4  ;;  %s1669_s8 = int_to_ptr.vmem [resolvable:$true] %s274_s8 }
  0x20   : > { %s1328_s19 = scalar_lea.hbm %s1907_s1, 2048 }
  0x21   : > { %p1663_p2 = pnand %p1206_p1, %p1628_p5  ;;  %p1329_p3 = scmp.ne.s32.totalorder %s1907_s1, %s1328_s19 }
  0x22   : > { %p1335_p12 = scmp.lt.u32.totalorder %s1328_s19, %s1907_s1 }
  0x23   : > { %p1679_p6 = pneg %p1663_p2 }
  0x25   : > { %p1331_p7 = pnand %p1679_p6, %p1329_p3 }
  0x27   : > { %p1332_p10 = pneg %p1331_p7 }
  0x29   : > { %p1337_p13 = pnand %p1335_p12, %p1332_p10 }
  0x2b   : > { %1340 = shalt.err (!%p1337_p13)
}
  0x2c   : > { %s1341_s9 = scalar_lea.vmem %s1657_s20, 2048  ;;  %p1349_p5 = scmp.lt.s32.totalorder %s1657_s20, %s1657_s20 }
  0x2d   : > { %p1342_p1 = scmp.ne.s32.totalorder %s1657_s20, %s1341_s9  ;;  %p1350_p8 = scmp.lt.s32.totalorder %s1341_s9, %s1341_s9 }
  0x2f   : > { %p1344_p11 = pnand %p1342_p1, %p1679_p6  ;;  %p1351_p3 = por %p1350_p8, %p1349_p5 }
  0x31   : > { %p1345_p9 = pneg %p1344_p11 }
  0x33   : > { %p1352_p7 = pnand %p1351_p3, %p1345_p9 }
  0x35   : > { %1355 = shalt.err (!%p1352_p7)
}
  0x36   : > { %s1535_s16 = smov 64   ;;  %s1536_s17 = smov 4  }
  0x37   : > { %1209 = dma.hbm_to_vmem [thread:$0]  (!%p1663_p2), %s1907_s1, 2048, %s1657_s20, [#allocation7], %s1535_s16, %s1535_s16, %s1536_s17  }
  0x38   : > { %s1356_s9 = scalar_lea.hbm %s1909_s3, 1024 }
  0x39   : > { %p1357_p5 = scmp.ne.s32.totalorder %s1909_s3, %s1356_s9  ;;  %p1363_p11 = scmp.lt.u32.totalorder %s1356_s9, %s1909_s3 }
  0x3b   : > { %p1359_p8 = pnand %p1357_p5, %p1679_p6 }
  0x3d   : > { %p1360_p9 = pneg %p1359_p8 }
  0x3f   : > { %p1365_p10 = pnand %p1363_p11, %p1360_p9 }
  0x41   : > { %1368 = shalt.err (!%p1365_p10)
}
  0x42   : > { %s1369_s20 = scalar_lea.vmem %s1667_s22, 1024  ;;  %p1377_p3 = scmp.lt.s32.totalorder %s1667_s22, %s1667_s22 }
  0x43   : > { %p1370_p12 = scmp.ne.s32.totalorder %s1667_s22, %s1369_s20  ;;  %p1378_p7 = scmp.lt.s32.totalorder %s1369_s20, %s1369_s20 }
  0x45   : > { %p1372_p13 = pnand %p1370_p12, %p1679_p6  ;;  %p1379_p5 = por %p1378_p7, %p1377_p3 }
  0x47   : > { %p1373_p1 = pneg %p1372_p13 }
  0x49   : > { %p1380_p8 = pnand %p1379_p5, %p1373_p1 }
  0x4b   : > { %1383 = shalt.err (!%p1380_p8)
}
  0x4c   : > { %1212 = dma.hbm_to_vmem [thread:$0]  (!%p1663_p2), %s1909_s3, 1024, %s1667_s22, [#allocation7], %s1535_s16, %s1535_s16, %s1536_s17  }
  0x4d   : > { %s1384_s10 = scalar_lea.hbm %s1911_s5, 1024 }
  0x4e   : > { %p1385_p9 = scmp.ne.s32.totalorder %s1911_s5, %s1384_s10  ;;  %p1391_p12 = scmp.lt.u32.totalorder %s1384_s10, %s1911_s5 }
  0x50   : > { %p1387_p11 = pnand %p1385_p9, %p1679_p6 }
  0x52   : > { %p1388_p10 = pneg %p1387_p11 }
  0x54   : > { %p1393_p13 = pnand %p1391_p12, %p1388_p10 }
  0x56   : > { %1396 = shalt.err (!%p1393_p13)
}
  0x57   : > { %s1397_s22 = scalar_lea.vmem %s1669_s8, 1024  ;;  %p1405_p5 = scmp.lt.s32.totalorder %s1669_s8, %s1669_s8 }
  0x58   : > { %p1398_p1 = scmp.ne.s32.totalorder %s1669_s8, %s1397_s22  ;;  %p1406_p8 = scmp.lt.s32.totalorder %s1397_s22, %s1397_s22 }
  0x5a   : > { %p1400_p3 = pnand %p1398_p1, %p1679_p6  ;;  %p1407_p9 = por %p1406_p8, %p1405_p5 }
  0x5c   : > { %p1401_p7 = pneg %p1400_p3 }
  0x5e   : > { %p1408_p11 = pnand %p1407_p9, %p1401_p7 }
  0x60   : > { %1411 = shalt.err (!%p1408_p11)
}
  0x61   : > { %1215 = dma.hbm_to_vmem [thread:$0]  (!%p1663_p2), %s1911_s5, 1024, %s1669_s8, [#allocation10], %s1535_s16, %s1535_s16, %s1536_s17  }
  0x62   : > { %p1028_p6 = scmp.ge.s32.totalorder %s1530_s29, 2 }
  0x64   : > { %287 = sbr.rel (%p1028_p6) target bundleno = 142 (0x8e), region = 40 }
  0x6b   : > { %290 = sbr.rel (!%p1624_p4) target bundleno = 142 (0x8e), region = 44  ;;  %s291_s21 = sand.u32 (%p1624_p4), 1, %s1518_s26  }
  0x6c   : > { %s296_s23 = smul.u32 (%p1624_p4), 3, %s1526_s28  ;;  %s1765_s16 = scalar_lea.sflag (%p1624_p4), [#allocation4], %s291_s21 }
  0x6d   : > { %s1189_s24 = smul.u32 (%p1624_p4), 48, %s291_s21 }
  0x6e   : > { %s298_s27 = ssub.s32 (%p1624_p4), 5, %s296_s23 }
  0x6f   : > { %p299_p10 = scmp.lt.s32.totalorder (%p1624_p4), %s298_s27, 3  ;;  %s295_s17 = scalar_lea.vmem (%p1624_p4), [#allocation3], %s1189_s24 }
  0x72   : > { %s1957_s27 = smov (!%p299_p10, %s298_s27), 3 }
  0x73   : > { %s1762_s15 = sshll.u32 %s1957_s27, 8 }
  0x74   : > { %s304_s8 = ssub.s32 768, %s1762_s15 }
  0x75   : > { %305 = vsyncadd %s1765_s16, %s304_s8  ;;  %p1031_p4 = scmp.ne.s32.totalorder %s1762_s15, 0  ;;  %s1100_s11 = smul.u32 768, %s1526_s28 }
  0x76   : > { %s312_s10 = sshll.u32 %s295_s17, 4  ;;  %s1416_s7 = scalar_lea.hbm %s1906_s0, 1280  ;;  %s1775_s10 = int_to_ptr.vmem [resolvable:$true] %s312_s10 }
  0x77   : > { %s1773_s30 = scalar_lea.hbm %s1906_s0, %s1100_s11 }
  0x78   : > { %s1412_s9 = scalar_lea.hbm %s1773_s30, %s1762_s15  ;;  %p1417_p1 = scmp.lt.u32.totalorder %s1773_s30, %s1906_s0 }
  0x79   : > { %p1413_p2 = scmp.ne.s32.totalorder %s1773_s30, %s1412_s9  ;;  %p1418_p3 = scmp.lt.u32.totalorder %s1416_s7, %s1412_s9 }
  0x7a   : > { %p1420_p5 = scmp.lt.u32.totalorder %s1412_s9, %s1773_s30 }
  0x7b   : > { %p1414_p12 = pnand %p1413_p2, %p1031_p4  ;;  %p1419_p7 = por %p1418_p3, %p1417_p1 }
  0x7d   : > { %p1415_p13 = pneg %p1414_p12  ;;  %p1421_p8 = por %p1420_p5, %p1419_p7 }
  0x7f   : > { %p1422_p9 = pnand %p1421_p8, %p1415_p13 }
  0x81   : > { %1425 = shalt.err (!%p1422_p9)
}
  0x82   : > { %s1426_s24 = scalar_lea.vmem %s1775_s10, %s1762_s15  ;;  %s1537_s27 = smov [#allocation3]  }
  0x83   : > { %p1427_p11 = scmp.ne.s32.totalorder %s1775_s10, %s1426_s24  ;;  %s1430_s8 = sshll.u32 %s1537_s27, 4  ;;  %s1431_s8 = int_to_ptr.vmem [resolvable:$false] %s1430_s8 }
  0x84   : > { %s1432_s17 = scalar_lea.vmem %s1431_s8, 1536  ;;  %p1433_p12 = scmp.lt.s32.totalorder %s1775_s10, %s1431_s8 }
  0x85   : > { %p1428_p10 = pnand %p1427_p11, %p1031_p4  ;;  %p1434_p1 = scmp.lt.s32.totalorder %s1432_s17, %s1426_s24 }
  0x87   : > { %p1429_p2 = pneg %p1428_p10  ;;  %p1435_p3 = por %p1434_p1, %p1433_p12 }
  0x89   : > { %p1436_p7 = pnand %p1435_p3, %p1429_p2 }
  0x8b   : > { %1439 = shalt.err (!%p1436_p7)
}
  0x8c   : > { %s1538_s11 = smov 256   ;;  %s1539_s13 = smov 16  }
  0x8d   : > { %318 = dma.hbm_to_vmem [thread:$0]  (%p1031_p4), %s1773_s30, %s1762_s15, %s1775_s10, %s1765_s16, %s1538_s11, %s1538_s11, %s1539_s13  }
  0x8e PF: > { %324 = sbr.rel (%p1653_p0) target bundleno = 914 (0x392), region = 48  ;;  %s1805_s19 = sand.u32 (!%p1653_p0), 1, %s1514_s25  }
  0x8f   : > { %s1190_s9 = smul.u32 (!%p1653_p0), 48, %s1805_s19  ;;  %s327_s22 = scalar_lea.sflag (!%p1653_p0), [#allocation4], %s1805_s19 }
  0x90   : > { %p1938_p13 = scmp.ne.s32.totalorder (!%p1653_p0), %s1929_s14, 0 }
  0x91   : > { %s1809_s20 = scalar_lea.vmem (!%p1653_p0), [#allocation3], %s1190_s9 }
  0x95   : > { %1493 = dma.done.wait (%p1938_p13), %s327_s22, 768  }
  0x96   : > { %1495 = vsyncadd (%p1938_p13), %s327_s22, 4294966528  ;;  %p1939_p4 = scmp.ne.s32.totalorder %s1928_s12, 0 }
  0x98   : > { %1497 = dma.done.wait (%p1939_p4), [#allocation7], 3072  }
  0x99   : > { %1499 = vsyncadd (%p1939_p4), [#allocation7], 4294964224 }
  0x9a   : > { %1501 = dma.done.wait (%p1939_p4), [#allocation10], 1024  }
  0x9b   : > { %1503 = vsyncadd (%p1939_p4), [#allocation10], 4294966272  ;;  %v1284_v0 = vld [vmem:[#allocation6 + $0x40] sm:$0xff]   ;;  %v1286_v2 = vld [vmem:[#allocation6 + $0x48] sm:$0xff]   ;;  %s1191_s30 = smul.u32 12, %s1805_s19  ;;  %s888_s21 = scalar_lea.sflag [#allocation5], %s1805_s19 }
  0x9c   : > { %v1285_v1 = vld [vmem:[#allocation6] sm:$0xff]   ;;  %1101 = vmatprep.subr.bf16.mxu0 %v1284_v0  ;;  %v1287_v3 = vld [vmem:[#allocation6 + $0x8] sm:$0xff]   ;;  %v1288_v4 = vld [vmem:[#allocation6 + $0x50] sm:$0xff]   ;;  %s1940_s23 = sld [smem:[#allocation19_spill]] }
  0x9d   : > { %1102 = vmatpush3.bf16.msra.mxu0 %v1285_v1  ;;  %v1289_v5 = vld [vmem:[#allocation6 + $0x10] sm:$0xff]   ;;  %v1290_v6 = vld [vmem:[#allocation6 + $0x58] sm:$0xff]   ;;  %v1292_v8 = vld [vmem:[#allocation6 + $0x60] sm:$0xff]   ;;  %s372_s7 = scalar_lea.vmem [#allocation11], %s1191_s30 }
  0x9e   : > { %1103 = vmatprep.subr.bf16.mxu0 %v1286_v2  ;;  %v1291_v7 = vld [vmem:[#allocation6 + $0x18] sm:$0xff]   ;;  %v1293_v9 = vld [vmem:[#allocation6 + $0x20] sm:$0xff]   ;;  %v1294_v10 = vld [vmem:[#allocation6 + $0x68] sm:$0xff]  }
  0x9f   : > { %v395_v11 = vld [vmem:[%s1809_s20 + $0x8] sm:$0xff]  ;;  %v397_v12 = vld [vmem:[%s1809_s20 + $0x18] sm:$0xff]  ;;  %v1300_v15 = vld [vmem:[#allocation8] sm:$0xff]  }
  0xa0   : > { %v1295_v13 = vld [vmem:[#allocation6 + $0x28] sm:$0xff]   ;;  %v401_v14 = vpack.c.bf16 %v397_v12, %v395_v11  ;;  %v1296_v17 = vld [vmem:[#allocation6 + $0x70] sm:$0xff]   ;;  %1149 = vmatprep.subr.bf16.mxu1 %v1300_v15  ;;  %v1298_v20 = vld [vmem:[#allocation6 + $0x78] sm:$0xff]  }
  0xa1   : > { %1104 = vmatpush3.bf16.msra.mxu0 %v1287_v3  ;;  %v1301_v16 = vld [vmem:[#allocation8 + $0x8] sm:$0xff]   ;;  %v1297_v18 = vld [vmem:[#allocation6 + $0x30] sm:$0xff]   ;;  %1150 = vmatpush3.bf16.msra.mxu1 %v1300_v15  ;;  %v1303_v21 = vld [vmem:[#allocation8 + $0x18] sm:$0xff]  }
  0xa2   : > { %1105 = vmatprep.subr.bf16.mxu0 %v1288_v4  ;;  %567 = vmatprep.mubr.bf16.mxu0 %v401_v14  ;;  %v1302_v19 = vld [vmem:[#allocation8 + $0x10] sm:$0xff]   ;;  %v1299_v22 = vld [vmem:[#allocation6 + $0x38] sm:$0xff]   ;;  %v1304_v30 = vld [vmem:[#allocation8 + $0x20] sm:$0xff]   ;;  %p1941_p0 = scmp.ne.s32.totalorder %s1940_s23, 0 }
  0xa3   : > { %1151 = vmatprep.subr.bf16.mxu1 %v1301_v16  ;;  %v394_v23 = vld [vmem:[%s1809_s20] sm:$0xff]  ;;  %v396_v24 = vld [vmem:[%s1809_s20 + $0x10] sm:$0xff]  ;;  %v399_v25 = vld [vmem:[%s1809_s20 + $0x28] sm:$0xff]  ;;  %s1942_s24 = sld [smem:[#allocation17_spill]] (%p1941_p0) }
  0xa4   : > { %v400_v26 = vpack.c.bf16 %v396_v24, %v394_v23  ;;  %v403_v27 = vpack.c.bf16 %v399_v25, %v399_v25  ;;  %v398_v28 = vld [vmem:[%s1809_s20 + $0x20] sm:$0xff]  ;;  %v1305_v31 = vld [vmem:[#allocation8 + $0x28] sm:$0xff]   ;;  %v1307_v33 = vld [vmem:[#allocation8 + $0x38] sm:$0xff]  }
  0xa5   : > { %1106 = vmatpush3.bf16.msra.mxu0 %v1289_v5  ;;  %1152 = vmatpush3.bf16.msra.mxu1 %v1301_v16  ;;  %v402_v29 = vpack.c.bf16 %v398_v28, %v398_v28  ;;  %v1306_v32 = vld [vmem:[#allocation8 + $0x30] sm:$0xff]   ;;  %v1308_v34 = vld [vmem:[#allocation9] sm:$0xff]   ;;  %v1309_v35 = vld [vmem:[#allocation9 + $0x8] sm:$0xff]  }
  0xa6   : > { %1107 = vmatprep.subr.bf16.mxu0 %v1290_v6  ;;  %1153 = vmatprep.subr.bf16.mxu1 %v1302_v19  ;;  %v1310_v36 = vld [vmem:[#allocation9 + $0x10] sm:$0xff]   ;;  %v1311_v37 = vld [vmem:[#allocation9 + $0x18] sm:$0xff]   ;;  %v1312_v38 = vld [vmem:[#allocation9 + $0x20] sm:$0xff]  }
  0xa7   : > { %v1313_v39 = vld [vmem:[#allocation9 + $0x28] sm:$0xff]   ;;  %v1056_v42 = vld [vmem:[%s1908_s2] ss:$0 sm:$0xff]  ;;  %v1314_v60 = vld [vmem:[#allocation9 + $0x30] sm:$0xff]  }
  0xa8   : > { %v1315_v61 = vld [vmem:[#allocation9 + $0x38] sm:$0xff]   ;;  %v1057_v62 = vld [vmem:[%s1910_s4] ss:$0 sm:$0xff] }
  0xa9   : > { %1108 = vmatpush3.bf16.msra.mxu0 %v1291_v7  ;;  %1154 = vmatpush3.bf16.msra.mxu1 %v1302_v19  ;;  %v1066_v11 = vld [vmem:[%s1912_s6] ss:$0 sm:$0xff]  ;;  %s895_s27 = smul.u32 (%p1941_p0), 3, %s1942_s24 }
  0xaa   : > { %1109 = vmatprep.subr.bf16.mxu0 %v1292_v8  ;;  %1155 = vmatprep.subr.bf16.mxu1 %v1303_v21 }
  0xab   : > { %s896_s8 = ssub.s32 (%p1941_p0), 5, %s895_s27 }
  0xac   : > { %p897_p5 = scmp.lt.s32.totalorder (%p1941_p0), %s896_s8, 3 }
  0xad   : > { %1110 = vmatpush3.bf16.msra.mxu0 %v1293_v9  ;;  %1156 = vmatpush3.bf16.msra.mxu1 %v1303_v21 }
  0xae   : > { %1111 = vmatprep.subr.bf16.mxu0 %v1294_v10  ;;  %1157 = vmatprep.subr.bf16.mxu1 %v1304_v30 }
  0xb1   : > { %1112 = vmatpush3.bf16.msra.mxu0 %v1295_v13  ;;  %1158 = vmatpush3.bf16.msra.mxu1 %v1304_v30 }
  0xb2   : > { %1113 = vmatprep.subr.bf16.mxu0 %v1296_v17  ;;  %1159 = vmatprep.subr.bf16.mxu1 %v1305_v31 }
  0xb5   : > { %1114 = vmatpush3.bf16.msra.mxu0 %v1297_v18  ;;  %1160 = vmatpush3.bf16.msra.mxu1 %v1305_v31 }
  0xb6   : > { %1115 = vmatprep.subr.bf16.mxu0 %v1298_v20  ;;  %1161 = vmatprep.subr.bf16.mxu1 %v1306_v32 }
  0xb9   : > { %1116 = vmatpush3.bf16.msra.mxu0 %v1299_v22  ;;  %1162 = vmatpush3.bf16.msra.mxu1 %v1306_v32 }
  0xba   : > { %1163 = vmatprep.subr.bf16.mxu1 %v1307_v33  ;;  %1169 = vmatprep.subr.bf16.mxu0 %v1308_v34 }
  0xbc   : > { %568 = vmatmul.mubr.bf16.vlgmr.msra.gmra.mrb[0].mxu0 %v400_v26 }
  0xbd   : > { %575 = vmatprep.mubr.bf16.mxu0 %v403_v27  ;;  %1164 = vmatpush3.bf16.msra.mxu1 %v1307_v33 }
  0xbe   : > { %1170 = vmatpush3.bf16.msra.mxu0 %v1308_v34 }
  0xbf   : > { %1171 = vmatprep.subr.bf16.mxu0 %v1309_v35 }
  0xc2   : > { %1172 = vmatpush3.bf16.msra.mxu0 %v1309_v35 }
  0xc3   : > { %1173 = vmatprep.subr.bf16.mxu0 %v1310_v36 }
  0xc4   : > { %576 = vmatmul.mubr.bf16.gmra.mrb[4].mxu0 %v402_v29 }
  0xc6   : > { %1174 = vmatpush3.bf16.msra.mxu0 %v1310_v36 }
  0xc7   : > { %1175 = vmatprep.subr.bf16.mxu0 %v1311_v37 }
  0xca   : > { %1176 = vmatpush3.bf16.msra.mxu0 %v1311_v37 }
  0xcb   : > { %1177 = vmatprep.subr.bf16.mxu0 %v1312_v38 }
  0xce   : > { %1178 = vmatpush3.bf16.msra.mxu0 %v1312_v38 }
  0xcf   : > { %1179 = vmatprep.subr.bf16.mxu0 %v1313_v39 }
  0xd2   : > { %1180 = vmatpush3.bf16.msra.mxu0 %v1313_v39 }
  0xd3   : > { %1181 = vmatprep.subr.bf16.mxu0 %v1314_v60 }
  0xd6   : > { %1182 = vmatpush3.bf16.msra.mxu0 %v1314_v60 }
  0xd7   : > { %1183 = vmatprep.subr.bf16.mxu0 %v1315_v61 }
  0xda   : > { %1184 = vmatpush3.bf16.msra.mxu0 %v1315_v61 }
 0x18f   : > { %v1117_v40 = vpop.f32.mrb[0].mxu0 }
 0x190   : > { %v1118_v41 = vpop.f32.mrb[1].mxu0 }
 0x191   : > { %v1119_v43 = vadd.f32 %v1118_v41, %v1117_v40  ;;  %v1120_v44 = vpop.f32.mrb[2].mxu0 }
 0x192   : > { %v1121_v45 = vpop.f32.mrb[3].mxu0 }
 0x193   : > { %v1122_v46 = vadd.f32 %v1121_v45, %v1120_v44  ;;  %v602_v47 = vadd.f32 %v1119_v43, %v1056_v42 }
 0x195   : > { %v603_v48 = vadd.f32 %v1122_v46, %v1056_v42  ;;  %v605_v50 = vmax.f32 %v602_v47, 0.0 }
 0x197   : > { %v1123_v49 = vpop.f32.mrb[4].mxu0  ;;  %v606_v51 = vmax.f32 %v603_v48, 0.0 }
 0x198   : > { %v1124_v52 = vpop.f32.mrb[5].mxu0 }
 0x199   : > { %v1125_v53 = vadd.f32 %v1124_v52, %v1123_v49  ;;  %v1126_v54 = vpop.f32.mrb[6].mxu0  ;;  %v608_v55 = vpack.c.bf16 %v606_v51, %v605_v50 }
 0x19a   : > { %v1127_v56 = vpop.f32.mrb[7].mxu0 }
 0x19b   : > { %v604_v57 = vadd.f32 %v1125_v53, %v1056_v42  ;;  %1165 = vmatprep.mubr.bf16.mxu1 %v608_v55 }
 0x19d   : > { %v607_v58 = vmax.f32 %v604_v57, 0.0 }
 0x19f   : > { %v609_v59 = vpack.c.bf16 %v607_v58, %v607_v58 }
 0x1a1   : > { %1166 = vmatmul.mubr.bf16.vlgmr.msra.gmra.mrb[0].mxu1 %v609_v59 }
 0x274   : > { %v1167_v63 = vpop.f32.mrb[0].mxu1 }
 0x275   : > { %v724_v0 = vadd.f32 %v1167_v63, %v1057_v62  ;;  %v715_v1 = vpop.f32.mrb[1].mxu1 }
 0x276   : > { %v716_v2 = vadd.f32 %v1057_v62, %v715_v1  ;;  %v1168_v3 = vpop.f32.mrb[2].mxu1 }
 0x277   : > { %v718_v4 = vpop.f32.mrb[3].mxu1  ;;  %v731_v6 = vmax.f32 %v724_v0, 0.0 }
 0x278   : > { %v719_v5 = vadd.f32 %v1057_v62, %v718_v4  ;;  %v729_v7 = vmax.f32 %v716_v2, 0.0 }
 0x279   : > { %v733_v10 = vpack.c.bf16 %v731_v6, %v731_v6 }
 0x27a   : > { %v730_v8 = vmax.f32 %v719_v5, 0.0 }
 0x27c   : > { %v732_v9 = vpack.c.bf16 %v730_v8, %v729_v7 }
 0x27e   : > { %1185 = vmatprep.mubr.bf16.mxu0 %v732_v9 }
 0x27f   : > { %1186 = vmatmul.mubr.bf16.vlgmr.msra.gmra.mrb[8].mxu0 %v733_v10 }
 0x352   : > { %v1187_v12 = vpop.f32.mrb[8].mxu0 }
 0x353   : > { %v848_v13 = vadd.f32 %v1187_v12, %v1066_v11  ;;  %v839_v14 = vpop.f32.mrb[9].mxu0 }
 0x354   : > { %v840_v15 = vadd.f32 %v1066_v11, %v839_v14  ;;  %v1188_v16 = vpop.f32.mrb[10].mxu0 }
 0x355   : > { %v1077_v17 = vmul.f32 -1.442695, %v848_v13  ;;  %v842_v18 = vpop.f32.mrb[11].mxu0 }
 0x356   : > { %v1075_v19 = vmul.f32 -1.442695, %v840_v15  ;;  %v843_v20 = vadd.f32 %v1066_v11, %v842_v18 }
 0x357   : > { %1316 = vpow2.f32 %v1077_v17 }
 0x358   : > { %1318 = vpow2.f32 %v1075_v19  ;;  %v1076_v21 = vmul.f32 -1.442695, %v843_v20 }
 0x35a   : > { %1320 = vpow2.f32 %v1076_v21 }
 0x361   : > { %v1317_v22 = vpop.eup %1316 }
 0x362   : > { %v1319_v23 = vpop.eup %1318  ;;  %v864_v24 = vadd.f32 1.0, %v1317_v22 }
 0x363   : > { %v862_v25 = vadd.f32 1.0, %v1319_v23 }
 0x364   : > { %v1321_v26 = vpop.eup %1320  ;;  %1322 = vrcp.f32 %v864_v24 }
 0x365   : > { %v863_v27 = vadd.f32 1.0, %v1321_v26  ;;  %1324 = vrcp.f32 %v862_v25 }
 0x367   : > { %1326 = vrcp.f32 %v863_v27 }
 0x36e   : > { %v1323_v28 = vpop.eup %1322  ;;  %894 = sbr.rel (!%p1941_p0) target bundleno = 914 (0x392), region = 76 }
 0x36f   : > { %v1093_v29 = vpack.c.bf16 %v1323_v28, %v1323_v28  ;;  %v1325_v30 = vpop.eup %1324 }
 0x371   : > { %v1327_v31 = vpop.eup %1326  ;;  %886 = vst [vmem:[%s372_s7 + $0x8] sm:$0xf] %v1093_v29 }
 0x372   : > { %v1098_v32 = vpack.c.bf16 %v1327_v31, %v1325_v30 }
 0x374   : > { %1099 = vst [vmem:[%s372_s7] sm:$0xff] %v1098_v32  }
 0x375   : > { %s1959_s8 = smov (!%p897_p5, %s896_s8), 3 }
 0x376   : > { %s1843_s17 = sshll.u32 %s1959_s8, 6 }
 0x377   : > { %s901_s11 = ssub.s32 192, %s1843_s17 }
 0x378   : > { %902 = vsyncadd %s888_s21, %s901_s11  ;;  %p1082_p8 = scmp.ne.s32.totalorder %s1843_s17, 0  ;;  %s1094_s13 = smul.u32 192, %s1942_s24 }
 0x379   : > { %s907_s9 = sshll.u32 %s372_s7, 4  ;;  %s1943_s12 = sld [smem:[#allocation22_spill]]  ;;  %s1855_s9 = int_to_ptr.vmem [resolvable:$true] %s907_s9 }
 0x37a   : > { %s1440_s18 = scalar_lea.vmem %s1855_s9, %s1843_s17  ;;  %s1540_s15 = smov [#allocation11]  }
 0x37b   : > { %p1441_p9 = scmp.ne.s32.totalorder %s1855_s9, %s1440_s18  ;;  %s1444_s16 = sshll.u32 %s1540_s15, 4  ;;  %s1445_s16 = int_to_ptr.vmem [resolvable:$false] %s1444_s16 }
 0x37c   : > { %s1446_s10 = scalar_lea.vmem %s1445_s16, 384  ;;  %p1447_p2 = scmp.lt.s32.totalorder %s1855_s9, %s1445_s16 }
 0x37d   : > { %p1442_p11 = pnand %p1441_p9, %p1082_p8  ;;  %p1448_p12 = scmp.lt.s32.totalorder %s1446_s10, %s1440_s18 }
 0x37f   : > { %s1853_s14 = scalar_lea.hbm %s1943_s12, %s1094_s13  ;;  %p1443_p10 = pneg %p1442_p11 }
 0x380   : > { %p1449_p1 = por %p1448_p12, %p1447_p2 }
 0x382   : > { %p1450_p3 = pnand %p1449_p1, %p1443_p10 }
 0x384   : > { %1453 = shalt.err (!%p1450_p3)
}
 0x385   : > { %s1454_s30 = scalar_lea.hbm %s1853_s14, %s1843_s17  ;;  %s1458_s24 = scalar_lea.hbm %s1943_s12, 320 }
 0x386   : > { %p1455_p7 = scmp.ne.s32.totalorder %s1853_s14, %s1454_s30  ;;  %p1459_p0 = scmp.lt.u32.totalorder %s1853_s14, %s1943_s12 }
 0x387   : > { %p1460_p5 = scmp.lt.u32.totalorder %s1458_s24, %s1454_s30  ;;  %p1462_p11 = scmp.lt.u32.totalorder %s1454_s30, %s1853_s14 }
 0x388   : > { %p1456_p13 = pnand %p1455_p7, %p1082_p8 }
 0x389   : > { %p1461_p9 = por %p1460_p5, %p1459_p0 }
 0x38a   : > { %p1457_p4 = pneg %p1456_p13 }
 0x38b   : > { %p1463_p10 = por %p1462_p11, %p1461_p9 }
 0x38d   : > { %p1464_p2 = pnand %p1463_p10, %p1457_p4 }
 0x38f   : > { %1467 = shalt.err (!%p1464_p2)
}
 0x390   : > { %s1541_s11 = smov 64   ;;  %s1542_s13 = smov 4  }
 0x391   : > { %913 = dma.vmem_to_hbm [thread:$0]  (%p1082_p8), %s1855_s9, %s1843_s17, %s1853_s14, %s888_s21, %s1541_s11, %s1541_s11, %s1542_s13  }
 0x392 PF: > { %s1944_s22 = sld [smem:[#allocation16_spill]]  ;;  %s1945_s20 = sld [smem:[#allocation21_spill]] }
 0x398   : > { %s922_s18 = sand.u32 1, %s1944_s22   ;;  %p1946_p12 = scmp.ne.s32.totalorder %s1945_s20, 0 }
 0x399   : > { %s923_s15 = scalar_lea.sflag [#allocation5], %s922_s18 }
 0x39a   : > { %p1217_p1 = pnand %p1028_p6, %p1946_p12 }
 0x39c   : > { %1505 = dma.done.wait (!%p1217_p1), %s923_s15, 192  }
 0x39d   : > { %1507 = vsyncadd (!%p1217_p1), %s923_s15, 4294967104  ;;  %s25_s29 = sadd.s32 1, %s1530_s29   ;;  %s1947_s16 = sld [smem:[#allocation20_spill]] }
 0x39e   : > { %p22_p3 = scmp.ge.s32.totalorder %s25_s29, 4   ;;  %s1948_s19 = sld [smem:[#allocation18_spill]] }
 0x39f   : > { %s1949_s24 = smov %s1514_s25  ;;  %s1950_s25 = smov %s1518_s26 }
 0x3a0   : > { %s1952_s27 = smov %s1526_s28  ;;  %24 = sbr.rel (!%p22_p3) target bundleno = 10 (0xa), region = 114 }
 0x3a3   : > { %s1951_s26 = smov %s1947_s16 }
 0x3a4   : > { %s1953_s28 = smov %s1948_s19 }
 0x3a7   :  { %928 = vsyncpa [#allocation4], 1 }
 0x3a8   :  { %930 = vsyncpa [#allocation4 + $0x1], 1 }
 0x3a9   :  { %931 = vsyncpa [#allocation7], 1 }
 0x3aa   :  { %932 = vsyncpa [#allocation10], 1 }
 0x3ab   :  { %933 = vsyncpa [#allocation5], 1 }
 0x3ac   :  { %935 = vsyncpa [#allocation5 + $0x1], 1 }

</bundles_post_ra>
